<compile_context>
chip_gen: v6e
topology: v6e:2x2x1
jax: 0.10.0
libtpu: 0.0.40
codegen_flags: <defaults>
</compile_context>

<pallas_src>
import functools

import numpy as np
import jax
import jax.numpy as jnp
from jax.experimental import pallas as pl
from jax.experimental.pallas import tpu as pltpu


# ----------------------------------------------------------------------------
# Host-side helpers
# ----------------------------------------------------------------------------
def _bilinear_matrix(in_size, out_size):
    """Interpolation matrix matching nn.Upsample(bilinear, align_corners=False)."""
    scale = in_size / out_size
    i = np.arange(out_size, dtype=np.float64)
    src = np.maximum(scale * (i + 0.5) - 0.5, 0.0)
    lo = np.minimum(np.floor(src).astype(np.int64), in_size - 1)
    hi = np.minimum(lo + 1, in_size - 1)
    frac = (src - lo).astype(np.float32)
    W = np.zeros((out_size, in_size), dtype=np.float32)
    W[np.arange(out_size), lo] += (1.0 - frac)
    W[np.arange(out_size), hi] += frac
    return W


def _combined_upsample_op(h_in, w_in, s_out, grid_h, grid_w):
    """(grid_h*grid_w, s_out*s_out) operator for a lane-flattened bilinear resize.

    The input lives on a (grid_h, grid_w) row-major lane-flattened grid of
    which only the top-left (h_in, w_in) entries are valid; invalid entries
    get weight 0, so junk in the margin of a full-grid conv output never
    propagates.  Shared by all channels (no kron over channels).
    """
    wh = _bilinear_matrix(h_in, s_out)                       # (s_out, h_in)
    ww = _bilinear_matrix(w_in, s_out)                       # (s_out, w_in)
    whp = np.zeros((s_out, grid_h), np.float32); whp[:, :h_in] = wh
    wwp = np.zeros((s_out, grid_w), np.float32); wwp[:, :w_in] = ww
    # [(h*grid_w + w), (o*s_out + q)] = wh[o, h] * ww[q, w]
    return np.kron(whp.T, wwp.T)


# ----------------------------------------------------------------------------
# Fused Pallas kernel: one batch element per grid step, everything in VMEM.
# ----------------------------------------------------------------------------
def _upblock_kernel(x_ref, skip_ref, u1_ref, w2_ref, b2_ref, u2_ref,
                    w1_ref, b1_ref, w3_ref, b3_ref, o_ref,
                    up1_sc, z_sc, h1_sc, *, s, cin, cout, csk, dot_dtype):
    f32 = jnp.float32
    ss = s * s
    sw = up1_sc.shape[1]                       # padded lane width (ss + 2s + 2)

    def mm(a, b):                              # MXU dot, f32 accumulation
        return jnp.dot(a.astype(dot_dtype), b.astype(dot_dtype),
                       preferred_element_type=f32)

    def taps(sc_ref, offs):
        # im2col rows: lane-offset windows of the padded lane-flattened grid.
        return jnp.concatenate([sc_ref[:, d:d + ss] for d in offs], axis=0)

    zpad_in = jnp.zeros((cin, sw - ss), f32)

    # ---- UpSample(x): ONE matmul against the combined separable operator ----
    up1_sc[:, :ss] = mm(x_ref[...], u1_ref[...])             # (Cin, S*S), valid
    up1_sc[:, ss:] = zpad_in                                  # finite pad for taps

    # ---- Conv2 (2x2 valid, Cin -> Cout): single im2col matmul ---------------
    r2 = taps(up1_sc, (0, 1, s, s + 1))                       # (4*Cin, S*S)
    conv2 = mm(w2_ref[...], r2) + b2_ref[...]                 # (Cout, S*S)
    # valid on the top-left (S-1)x(S-1); margin holds finite junk only.

    # ---- UpSample2: U2 carries zero weights for conv2's invalid margin ------
    up2 = mm(conv2, u2_ref[...])                              # (Cout, S*S), valid

    # ---- CopyCropConcat: channel concat == two stores into one scratch ------
    z_sc[:csk, :ss] = skip_ref[...]                           # pre-cropped skip
    z_sc[csk:, :ss] = up2
    z_sc[:, ss:] = zpad_in

    # ---- Block1: 3x3 conv + folded BN + ReLU, ONE matmul --------------------
    offs9 = tuple(kh * s + kw for kh in range(3) for kw in range(3))
    h1 = jnp.maximum(mm(w1_ref[...], taps(z_sc, offs9)) + b1_ref[...], 0.0)
    h1_sc[:, :ss] = h1                                        # valid (S-2)x(S-2)
    h1_sc[:, ss:] = jnp.zeros((cout, sw - ss), f32)

    # ---- Block2: 3x3 conv + folded BN + ReLU, ONE matmul --------------------
    out = jnp.maximum(mm(w3_ref[...], taps(h1_sc, offs9)) + b3_ref[...], 0.0)
    o_ref[...] = out.astype(o_ref.dtype)                      # lane-dense (Cout, S*S)


# ----------------------------------------------------------------------------
# Wrapper: host-side weight folding + single pallas_call
# ----------------------------------------------------------------------------
def unet_upblock_forward(x_nchw, copied_nchw, params, up_size, eps=1e-5):
    f32 = jnp.float32
    N, Cin, H0, W0 = x_nchw.shape
    _, Csk, Hc, Wc = copied_nchw.shape
    Cout = params["conv2_w"].shape[3]
    S = int(up_size)
    SS = S * S
    assert Csk + Cout == Cin, "skip + upsampled channels must equal Block1 in_channels"
    crop = (Hc - S) // 2
    assert Hc - 2 * crop == S and Wc - 2 * crop == S, "skip crop must match up_size"
    # TODO(synk): odd (Hc - S) also fails in PyTorch (concat size mismatch); only the
    #             symmetric even-difference crop is supported here.

    # bf16 MXU operands on TPU (perf feedback); f32 otherwise -- the CPU
    # interpret path rejects BF16 x BF16 = F32 dots (DotThunk).
    compute_dtype = jnp.bfloat16 if jax.default_backend() == "tpu" else f32

    # Lane-flattened inputs; skip is center-cropped by XLA outside the kernel.
    x_flat = x_nchw.reshape(N, Cin, H0 * W0)
    skip_flat = copied_nchw[:, :, crop:crop + S, crop:crop + S].reshape(N, Csk, SS)

    # Bilinear resize operators on the lane-flattened grid (channel-shared).
    u1 = jnp.asarray(_combined_upsample_op(H0, W0, S, H0, W0), compute_dtype)
    u2 = jnp.asarray(_combined_upsample_op(S - 1, S - 1, S, S, S), compute_dtype)

    # Conv weights as (Cout, taps*Cin) im2col matrices (tap-major), BN folded.
    def im2col_w(w_hwio):
        kh, kw, ci, co = w_hwio.shape
        return jnp.transpose(w_hwio, (3, 0, 1, 2)).reshape(co, kh * kw * ci)

    def fold_bn(w_hwio, b, gamma, beta, mean, var):
        scale = gamma / jnp.sqrt(var + eps)                  # per out-channel
        return w_hwio * scale, (b - mean) * scale + beta

    w2 = im2col_w(params["conv2_w"]).astype(compute_dtype)
    b2 = params["conv2_b"].reshape(Cout, 1).astype(f32)
    w1f, b1f = fold_bn(params["b1_w"], params["b1_b"], params["b1_gamma"],
                       params["b1_beta"], params["b1_mean"], params["b1_var"])
    w1 = im2col_w(w1f).astype(compute_dtype)
    b1 = b1f.reshape(Cout, 1).astype(f32)
    w3f, b3f = fold_bn(params["b2_w"], params["b2_b"], params["b2_gamma"],
                       params["b2_beta"], params["b2_mean"], params["b2_var"])
    w3 = im2col_w(w3f).astype(compute_dtype)
    b3 = b3f.reshape(Cout, 1).astype(f32)

    sw = SS + 2 * S + 2      # scratch lane width: full grid + max 3x3 tap offset

    kern = functools.partial(_upblock_kernel, s=S, cin=Cin, cout=Cout, csk=Csk,
                             dot_dtype=compute_dtype)
    full2d = lambda n: (0, 0)

    out = pl.pallas_call(
        kern,
        out_shape=jax.ShapeDtypeStruct((N, Cout, SS), f32),
        grid=(N,),
        in_specs=[
            pl.BlockSpec((None, Cin, H0 * W0), lambda n: (n, 0, 0)),  # x (lane-flat)
            pl.BlockSpec((None, Csk, SS), lambda n: (n, 0, 0)),       # cropped skip
            pl.BlockSpec(u1.shape, full2d),                           # upsample-1 op
            pl.BlockSpec(w2.shape, full2d),                           # conv2 im2col W
            pl.BlockSpec(b2.shape, full2d),                           # conv2 bias
            pl.BlockSpec(u2.shape, full2d),                           # upsample-2 op
            pl.BlockSpec(w1.shape, full2d),                           # block1 im2col W
            pl.BlockSpec(b1.shape, full2d),                           # block1 folded bias
            pl.BlockSpec(w3.shape, full2d),                           # block2 im2col W
            pl.BlockSpec(b3.shape, full2d),                           # block2 folded bias
        ],
        out_specs=pl.BlockSpec((None, Cout, SS), lambda n: (n, 0, 0)),
        scratch_shapes=[
            pltpu.VMEM((Cin, sw), f32),      # up1 (full SxS grid + tap pad)
            pltpu.VMEM((Cin, sw), f32),      # [cropped skip ; up2]
            pltpu.VMEM((Cout, sw), f32),     # block1 output
        ],
        compiler_params=pltpu.CompilerParams(
            dimension_semantics=("parallel",),
            vmem_limit_bytes=48 * 1024 * 1024,   # explicit budget (v7x: 64 MiB phys)
        ),
    )(x_flat, skip_flat, u1, w2, b2, u2, w1, b1, w3, b3)

    # Valid region is the top-left (S-4)x(S-4) of the lane-dense full grid.
    return out.reshape(N, Cout, S, S)[:, :, :S - 4, :S - 4]


# ----------------------------------------------------------------------------
# Independent pure-XLA reference (f32, eval-mode BatchNorm)
# ----------------------------------------------------------------------------
def _reference_forward(x, copied, params, up_size, eps=1e-5):
    S = int(up_size)

    def upsample(a):
        wh = jnp.asarray(_bilinear_matrix(a.shape[2], S))
        ww = jnp.asarray(_bilinear_matrix(a.shape[3], S))
        return jnp.einsum("oh,nchw,pw->ncop", wh, a, ww)

    def conv_valid(a, w_hwio, b):
        y = jax.lax.conv_general_dilated(
            a, w_hwio, window_strides=(1, 1), padding="VALID",
            dimension_numbers=("NCHW", "HWIO", "NCHW"))
        return y + b.reshape(1, -1, 1, 1)

    def bn(y, gamma, beta, mean, var):
        inv = (gamma / jnp.sqrt(var + eps)).reshape(1, -1, 1, 1)
        return (y - mean.reshape(1, -1, 1, 1)) * inv + beta.reshape(1, -1, 1, 1)

    u = upsample(x)
    u = conv_valid(u, params["conv2_w"], params["conv2_b"])
    u = upsample(u)
    p = (copied.shape[2] - S) // 2
    z = jnp.concatenate([copied[:, :, p:p + S, p:p + S], u], axis=1)
    z = jnp.maximum(bn(conv_valid(z, params["b1_w"], params["b1_b"]),
                       params["b1_gamma"], params["b1_beta"],
                       params["b1_mean"], params["b1_var"]), 0.0)
    z = jnp.maximum(bn(conv_valid(z, params["b2_w"], params["b2_b"]),
                       params["b2_gamma"], params["b2_beta"],
                       params["b2_mean"], params["b2_var"]), 0.0)
    return z


def init_params(in_channels, out_channels, key):
    ks = jax.random.split(key, 6)
    f32 = jnp.float32
    return {
        # HWIO conv weights.
        "conv2_w": 0.1 * jax.random.normal(ks[0], (2, 2, in_channels, out_channels), f32),
        "conv2_b": 0.05 * jax.random.normal(ks[1], (out_channels,), f32),
        "b1_w": 0.1 * jax.random.normal(ks[2], (3, 3, in_channels, out_channels), f32),
        "b1_b": 0.05 * jax.random.normal(ks[3], (out_channels,), f32),
        "b1_gamma": 1.0 + 0.1 * jnp.arange(out_channels, dtype=f32),
        "b1_beta": 0.01 * jnp.arange(out_channels, dtype=f32),
        "b1_mean": 0.05 * jnp.arange(out_channels, dtype=f32),
        "b1_var": 1.0 + 0.02 * jnp.arange(out_channels, dtype=f32),
        "b2_w": 0.1 * jax.random.normal(ks[4], (3, 3, out_channels, out_channels), f32),
        "b2_b": 0.05 * jax.random.normal(ks[5], (out_channels,), f32),
        "b2_gamma": 1.0 + 0.05 * jnp.arange(out_channels, dtype=f32),
        "b2_beta": 0.02 * jnp.arange(out_channels, dtype=f32),
        "b2_mean": 0.03 * jnp.arange(out_channels, dtype=f32),
        "b2_var": 1.0 + 0.01 * jnp.arange(out_channels, dtype=f32),
    }


if __name__ == "__main__":
    in_channels, out_channels, up_size = 8, 4, 16
    N = 2

    key = jax.random.PRNGKey(0)
    kx, kc, kp = jax.random.split(key, 3)

    # x: decoder feature map (NCHW); CopiedFeatureMap: skip connection with
    # in_channels - out_channels channels (so the concat has in_channels channels).
    x = jax.random.normal(kx, (N, in_channels, 8, 8), jnp.float32)
    copied = jax.random.normal(kc, (N, in_channels - out_channels, 20, 20), jnp.float32)
    params = init_params(in_channels, out_channels, kp)

    fwd = jax.jit(unet_upblock_forward, static_argnums=3)
    out = jax.block_until_ready(fwd(x, copied, params, up_size))

    assert out.shape == (N, out_channels, up_size - 4, up_size - 4), out.shape
    assert bool(jnp.all(jnp.isfinite(out)))

    ref = _reference_forward(x, copied, params, up_size)
    # bf16 MXU operands on TPU -> looser tolerance; f32 path is checked tightly.
    tol = 8e-2 if jax.default_backend() == "tpu" else 2e-3
    err = float(jnp.max(jnp.abs(out - ref)))
    assert bool(jnp.allclose(out, ref, atol=tol, rtol=tol)), f"max|err|={err}"

    print("KERNEL_OK")
</pallas_src>

<mosaic_0001>
module attributes {stable_mosaic.version = 11 : i64} {
  func.func @_upblock_kernel(%arg0: i32, %arg1: memref<1x8x64xf32, #tpu.memory_space<vmem>>, %arg2: memref<1x4x256xf32, #tpu.memory_space<vmem>>, %arg3: memref<64x256xf32, #tpu.memory_space<vmem>>, %arg4: memref<4x32xf32, #tpu.memory_space<vmem>>, %arg5: memref<4x1xf32, #tpu.memory_space<vmem>>, %arg6: memref<256x256xf32, #tpu.memory_space<vmem>>, %arg7: memref<4x72xf32, #tpu.memory_space<vmem>>, %arg8: memref<4x1xf32, #tpu.memory_space<vmem>>, %arg9: memref<4x36xf32, #tpu.memory_space<vmem>>, %arg10: memref<4x1xf32, #tpu.memory_space<vmem>>, %arg11: memref<1x4x256xf32, #tpu.memory_space<vmem>>, %arg12: memref<8x290xf32, #tpu.memory_space<vmem>>, %arg13: memref<8x290xf32, #tpu.memory_space<vmem>>, %arg14: memref<4x290xf32, #tpu.memory_space<vmem>>) attributes {dimension_semantics = [#tpu.dimension_semantics<parallel>], iteration_bounds = array<i64: 2>, scalar_prefetch = 0 : i64, scratch_operands = 3 : i64, tpu.core_type = #tpu.core_type<tc>, window_params = [{transform_indices = @transform_0, window_bounds = array<i64: 1, 8, 64>}, {transform_indices = @transform_1, window_bounds = array<i64: 1, 4, 256>}, {pipeline_mode = #tpu.pipeline_mode<synchronous>, transform_indices = @transform_2, window_bounds = array<i64: 64, 256>}, {pipeline_mode = #tpu.pipeline_mode<synchronous>, transform_indices = @transform_3, window_bounds = array<i64: 4, 32>}, {pipeline_mode = #tpu.pipeline_mode<synchronous>, transform_indices = @transform_4, window_bounds = array<i64: 4, 1>}, {pipeline_mode = #tpu.pipeline_mode<synchronous>, transform_indices = @transform_5, window_bounds = array<i64: 256, 256>}, {pipeline_mode = #tpu.pipeline_mode<synchronous>, transform_indices = @transform_6, window_bounds = array<i64: 4, 72>}, {pipeline_mode = #tpu.pipeline_mode<synchronous>, transform_indices = @transform_7, window_bounds = array<i64: 4, 1>}, {pipeline_mode = #tpu.pipeline_mode<synchronous>, transform_indices = @transform_8, window_bounds = array<i64: 4, 36>}, {pipeline_mode = #tpu.pipeline_mode<synchronous>, transform_indices = @transform_9, window_bounds = array<i64: 4, 1>}, {transform_indices = @transform_10, window_bounds = array<i64: 1, 4, 256>}]} {
    %cst = arith.constant 0.000000e+00 : f32
    %0 = vector.broadcast %cst : f32 to vector<8x34xf32>
    %c0 = arith.constant 0 : index
    %c0_0 = arith.constant 0 : index
    %c0_1 = arith.constant 0 : index
    %1 = vector.load %arg1[%c0, %c0_0, %c0_1] : memref<1x8x64xf32, #tpu.memory_space<vmem>>, vector<1x8x64xf32>
    %2 = vector.shape_cast %1 : vector<1x8x64xf32> to vector<8x64xf32>
    %c0_2 = arith.constant 0 : index
    %c0_3 = arith.constant 0 : index
    %3 = vector.load %arg3[%c0_2, %c0_3] : memref<64x256xf32, #tpu.memory_space<vmem>>, vector<64x256xf32>
    %cst_4 = arith.constant dense<0.000000e+00> : vector<8x256xf32>
    %4 = tpu.matmul %2, %3, %cst_4 {dimension_numbers = #tpu.dot_dimension_numbers<[1], [0], [0], [1], [0, 0, 1, 1], [], []>} : vector<8x64xf32>, vector<64x256xf32>, vector<8x256xf32> -> vector<8x256xf32>
    %c0_5 = arith.constant 0 : index
    %c0_6 = arith.constant 0 : index
    %5 = vector.load %arg12[%c0_5, %c0_6] : memref<8x290xf32, #tpu.memory_space<vmem>>, vector<8x256xf32>
    tpu.vector_store %arg12[%c0_5, %c0_6], %4 {strides = array<i32>} : memref<8x290xf32, #tpu.memory_space<vmem>>, vector<8x256xf32>,
    %c0_7 = arith.constant 0 : index
    %c256 = arith.constant 256 : index
    %6 = vector.load %arg12[%c0_7, %c256] : memref<8x290xf32, #tpu.memory_space<vmem>>, vector<8x34xf32>
    tpu.vector_store %arg12[%c0_7, %c256], %0 {strides = array<i32>} : memref<8x290xf32, #tpu.memory_space<vmem>>, vector<8x34xf32>,
    %c0_8 = arith.constant 0 : index
    %c0_9 = arith.constant 0 : index
    %7 = vector.load %arg12[%c0_8, %c0_9] : memref<8x290xf32, #tpu.memory_space<vmem>>, vector<8x256xf32>
    %c0_10 = arith.constant 0 : index
    %c1 = arith.constant 1 : index
    %8 = vector.load %arg12[%c0_10, %c1] : memref<8x290xf32, #tpu.memory_space<vmem>>, vector<8x256xf32>
    %c0_11 = arith.constant 0 : index
    %c16 = arith.constant 16 : index
    %9 = vector.load %arg12[%c0_11, %c16] : memref<8x290xf32, #tpu.memory_space<vmem>>, vector<8x256xf32>
    %c0_12 = arith.constant 0 : index
    %c17 = arith.constant 17 : index
    %10 = vector.load %arg12[%c0_12, %c17] : memref<8x290xf32, #tpu.memory_space<vmem>>, vector<8x256xf32>
    %11 = tpu.concatenate %7, %8, %9, %10 in 0 : vector<8x256xf32>, vector<8x256xf32>, vector<8x256xf32>, vector<8x256xf32> -> vector<32x256xf32>
    %c0_13 = arith.constant 0 : index
    %c0_14 = arith.constant 0 : index
    %12 = vector.load %arg4[%c0_13, %c0_14] : memref<4x32xf32, #tpu.memory_space<vmem>>, vector<4x32xf32>
    %cst_15 = arith.constant dense<0.000000e+00> : vector<4x256xf32>
    %13 = tpu.matmul %12, %11, %cst_15 {dimension_numbers = #tpu.dot_dimension_numbers<[1], [0], [0], [1], [0, 0, 1, 1], [], []>} : vector<4x32xf32>, vector<32x256xf32>, vector<4x256xf32> -> vector<4x256xf32>
    %c0_16 = arith.constant 0 : index
    %c0_17 = arith.constant 0 : index
    %14 = vector.load %arg5[%c0_16, %c0_17] : memref<4x1xf32, #tpu.memory_space<vmem>>, vector<4x1xf32>
    %15 = vector.broadcast %14 : vector<4x1xf32> to vector<4x256xf32>
    %16 = arith.addf %13, %15 : vector<4x256xf32>
    %c0_18 = arith.constant 0 : index
    %c0_19 = arith.constant 0 : index
    %17 = vector.load %arg6[%c0_18, %c0_19] : memref<256x256xf32, #tpu.memory_space<vmem>>, vector<256x256xf32>
    %cst_20 = arith.constant dense<0.000000e+00> : vector<4x256xf32>
    %18 = tpu.matmul %16, %17, %cst_20 {dimension_numbers = #tpu.dot_dimension_numbers<[1], [0], [0], [1], [0, 0, 1, 1], [], []>} : vector<4x256xf32>, vector<256x256xf32>, vector<4x256xf32> -> vector<4x256xf32>
    %c0_21 = arith.constant 0 : index
    %c0_22 = arith.constant 0 : index
    %c0_23 = arith.constant 0 : index
    %19 = vector.load %arg2[%c0_21, %c0_22, %c0_23] : memref<1x4x256xf32, #tpu.memory_space<vmem>>, vector<1x4x256xf32>
    %20 = vector.shape_cast %19 : vector<1x4x256xf32> to vector<4x256xf32>
    %c0_24 = arith.constant 0 : index
    %c0_25 = arith.constant 0 : index
    %21 = vector.load %arg13[%c0_24, %c0_25] : memref<8x290xf32, #tpu.memory_space<vmem>>, vector<4x256xf32>
    tpu.vector_store %arg13[%c0_24, %c0_25], %20 {strides = array<i32>} : memref<8x290xf32, #tpu.memory_space<vmem>>, vector<4x256xf32>,
    %c4 = arith.constant 4 : index
    %c0_26 = arith.constant 0 : index
    %22 = vector.load %arg13[%c4, %c0_26] : memref<8x290xf32, #tpu.memory_space<vmem>>, vector<4x256xf32>
    tpu.vector_store %arg13[%c4, %c0_26], %18 {strides = array<i32>} : memref<8x290xf32, #tpu.memory_space<vmem>>, vector<4x256xf32>,
    %c0_27 = arith.constant 0 : index
    %c256_28 = arith.constant 256 : index
    %23 = vector.load %arg13[%c0_27, %c256_28] : memref<8x290xf32, #tpu.memory_space<vmem>>, vector<8x34xf32>
    tpu.vector_store %arg13[%c0_27, %c256_28], %0 {strides = array<i32>} : memref<8x290xf32, #tpu.memory_space<vmem>>, vector<8x34xf32>,
    %c0_29 = arith.constant 0 : index
    %c0_30 = arith.constant 0 : index
    %24 = vector.load %arg7[%c0_29, %c0_30] : memref<4x72xf32, #tpu.memory_space<vmem>>, vector<4x72xf32>
    %c0_31 = arith.constant 0 : index
    %c0_32 = arith.constant 0 : index
    %25 = vector.load %arg13[%c0_31, %c0_32] : memref<8x290xf32, #tpu.memory_space<vmem>>, vector<8x256xf32>
    %c0_33 = arith.constant 0 : index
    %c1_34 = arith.constant 1 : index
    %26 = vector.load %arg13[%c0_33, %c1_34] : memref<8x290xf32, #tpu.memory_space<vmem>>, vector<8x256xf32>
    %c0_35 = arith.constant 0 : index
    %c2 = arith.constant 2 : index
    %27 = vector.load %arg13[%c0_35, %c2] : memref<8x290xf32, #tpu.memory_space<vmem>>, vector<8x256xf32>
    %c0_36 = arith.constant 0 : index
    %c16_37 = arith.constant 16 : index
    %28 = vector.load %arg13[%c0_36, %c16_37] : memref<8x290xf32, #tpu.memory_space<vmem>>, vector<8x256xf32>
    %c0_38 = arith.constant 0 : index
    %c17_39 = arith.constant 17 : index
    %29 = vector.load %arg13[%c0_38, %c17_39] : memref<8x290xf32, #tpu.memory_space<vmem>>, vector<8x256xf32>
    %c0_40 = arith.constant 0 : index
    %c18 = arith.constant 18 : index
    %30 = vector.load %arg13[%c0_40, %c18] : memref<8x290xf32, #tpu.memory_space<vmem>>, vector<8x256xf32>
    %c0_41 = arith.constant 0 : index
    %c32 = arith.constant 32 : index
    %31 = vector.load %arg13[%c0_41, %c32] : memref<8x290xf32, #tpu.memory_space<vmem>>, vector<8x256xf32>
    %c0_42 = arith.constant 0 : index
    %c33 = arith.constant 33 : index
    %32 = vector.load %arg13[%c0_42, %c33] : memref<8x290xf32, #tpu.memory_space<vmem>>, vector<8x256xf32>
    %c0_43 = arith.constant 0 : index
    %c34 = arith.constant 34 : index
    %33 = vector.load %arg13[%c0_43, %c34] : memref<8x290xf32, #tpu.memory_space<vmem>>, vector<8x256xf32>
    %34 = tpu.concatenate %25, %26, %27, %28, %29, %30, %31, %32, %33 in 0 : vector<8x256xf32>, vector<8x256xf32>, vector<8x256xf32>, vector<8x256xf32>, vector<8x256xf32>, vector<8x256xf32>, vector<8x256xf32>, vector<8x256xf32>, vector<8x256xf32> -> vector<72x256xf32>
    %cst_44 = arith.constant dense<0.000000e+00> : vector<4x256xf32>
    %35 = tpu.matmul %24, %34, %cst_44 {dimension_numbers = #tpu.dot_dimension_numbers<[1], [0], [0], [1], [0, 0, 1, 1], [], []>} : vector<4x72xf32>, vector<72x256xf32>, vector<4x256xf32> -> vector<4x256xf32>
    %c0_45 = arith.constant 0 : index
    %c0_46 = arith.constant 0 : index
    %36 = vector.load %arg8[%c0_45, %c0_46] : memref<4x1xf32, #tpu.memory_space<vmem>>, vector<4x1xf32>
    %37 = vector.broadcast %36 : vector<4x1xf32> to vector<4x256xf32>
    %38 = arith.addf %35, %37 : vector<4x256xf32>
    %cst_47 = arith.constant 0.000000e+00 : f32
    %39 = vector.broadcast %cst_47 : f32 to vector<4x256xf32>
    %40 = arith.maximumf %38, %39 : vector<4x256xf32>
    %c0_48 = arith.constant 0 : index
    %c0_49 = arith.constant 0 : index
    %41 = vector.load %arg14[%c0_48, %c0_49] : memref<4x290xf32, #tpu.memory_space<vmem>>, vector<4x256xf32>
    tpu.vector_store %arg14[%c0_48, %c0_49], %40 {strides = array<i32>} : memref<4x290xf32, #tpu.memory_space<vmem>>, vector<4x256xf32>,
    %cst_50 = arith.constant 0.000000e+00 : f32
    %42 = vector.broadcast %cst_50 : f32 to vector<4x34xf32>
    %c0_51 = arith.constant 0 : index
    %c256_52 = arith.constant 256 : index
    %43 = vector.load %arg14[%c0_51, %c256_52] : memref<4x290xf32, #tpu.memory_space<vmem>>, vector<4x34xf32>
    tpu.vector_store %arg14[%c0_51, %c256_52], %42 {strides = array<i32>} : memref<4x290xf32, #tpu.memory_space<vmem>>, vector<4x34xf32>,
    %c0_53 = arith.constant 0 : index
    %c0_54 = arith.constant 0 : index
    %44 = vector.load %arg9[%c0_53, %c0_54] : memref<4x36xf32, #tpu.memory_space<vmem>>, vector<4x36xf32>
    %c0_55 = arith.constant 0 : index
    %c0_56 = arith.constant 0 : index
    %45 = vector.load %arg14[%c0_55, %c0_56] : memref<4x290xf32, #tpu.memory_space<vmem>>, vector<4x256xf32>
    %c0_57 = arith.constant 0 : index
    %c1_58 = arith.constant 1 : index
    %46 = vector.load %arg14[%c0_57, %c1_58] : memref<4x290xf32, #tpu.memory_space<vmem>>, vector<4x256xf32>
    %c0_59 = arith.constant 0 : index
    %c2_60 = arith.constant 2 : index
    %47 = vector.load %arg14[%c0_59, %c2_60] : memref<4x290xf32, #tpu.memory_space<vmem>>, vector<4x256xf32>
    %c0_61 = arith.constant 0 : index
    %c16_62 = arith.constant 16 : index
    %48 = vector.load %arg14[%c0_61, %c16_62] : memref<4x290xf32, #tpu.memory_space<vmem>>, vector<4x256xf32>
    %c0_63 = arith.constant 0 : index
    %c17_64 = arith.constant 17 : index
    %49 = vector.load %arg14[%c0_63, %c17_64] : memref<4x290xf32, #tpu.memory_space<vmem>>, vector<4x256xf32>
    %c0_65 = arith.constant 0 : index
    %c18_66 = arith.constant 18 : index
    %50 = vector.load %arg14[%c0_65, %c18_66] : memref<4x290xf32, #tpu.memory_space<vmem>>, vector<4x256xf32>
    %c0_67 = arith.constant 0 : index
    %c32_68 = arith.constant 32 : index
    %51 = vector.load %arg14[%c0_67, %c32_68] : memref<4x290xf32, #tpu.memory_space<vmem>>, vector<4x256xf32>
    %c0_69 = arith.constant 0 : index
    %c33_70 = arith.constant 33 : index
    %52 = vector.load %arg14[%c0_69, %c33_70] : memref<4x290xf32, #tpu.memory_space<vmem>>, vector<4x256xf32>
    %c0_71 = arith.constant 0 : index
    %c34_72 = arith.constant 34 : index
    %53 = vector.load %arg14[%c0_71, %c34_72] : memref<4x290xf32, #tpu.memory_space<vmem>>, vector<4x256xf32>
    %54 = tpu.concatenate %45, %46, %47, %48, %49, %50, %51, %52, %53 in 0 : vector<4x256xf32>, vector<4x256xf32>, vector<4x256xf32>, vector<4x256xf32>, vector<4x256xf32>, vector<4x256xf32>, vector<4x256xf32>, vector<4x256xf32>, vector<4x256xf32> -> vector<36x256xf32>
    %cst_73 = arith.constant dense<0.000000e+00> : vector<4x256xf32>
    %55 = tpu.matmul %44, %54, %cst_73 {dimension_numbers = #tpu.dot_dimension_numbers<[1], [0], [0], [1], [0, 0, 1, 1], [], []>} : vector<4x36xf32>, vector<36x256xf32>, vector<4x256xf32> -> vector<4x256xf32>
    %c0_74 = arith.constant 0 : index
    %c0_75 = arith.constant 0 : index
    %56 = vector.load %arg10[%c0_74, %c0_75] : memref<4x1xf32, #tpu.memory_space<vmem>>, vector<4x1xf32>
    %57 = vector.broadcast %56 : vector<4x1xf32> to vector<4x256xf32>
    %58 = arith.addf %55, %57 : vector<4x256xf32>
    %cst_76 = arith.constant 0.000000e+00 : f32
    %59 = vector.broadcast %cst_76 : f32 to vector<4x256xf32>
    %60 = arith.maximumf %58, %59 : vector<4x256xf32>
    %c0_77 = arith.constant 0 : index
    %c0_78 = arith.constant 0 : index
    %c0_79 = arith.constant 0 : index
    %61 = vector.load %arg11[%c0_77, %c0_78, %c0_79] : memref<1x4x256xf32, #tpu.memory_space<vmem>>, vector<1x4x256xf32>
    %62 = vector.shape_cast %61 : vector<1x4x256xf32> to vector<4x256xf32>
    %63 = vector.shape_cast %60 : vector<4x256xf32> to vector<1x4x256xf32>
    tpu.vector_store %arg11[%c0_77, %c0_78, %c0_79], %63 {strides = array<i32>} : memref<1x4x256xf32, #tpu.memory_space<vmem>>, vector<1x4x256xf32>,
    return
  }
  func.func @transform_0(%arg0: i32) -> (i32, i32, i32) {
    %c0_i32 = arith.constant 0 : i32
    %c0_i32_0 = arith.constant 0 : i32
    %c0_i32_1 = arith.constant 0 : i32
    return %arg0, %c0_i32, %c0_i32_0 : i32, i32, i32
  }
  func.func @transform_1(%arg0: i32) -> (i32, i32, i32) {
    %c0_i32 = arith.constant 0 : i32
    %c0_i32_0 = arith.constant 0 : i32
    %c0_i32_1 = arith.constant 0 : i32
    return %arg0, %c0_i32, %c0_i32_0 : i32, i32, i32
  }
  func.func @transform_2(%arg0: i32) -> (i32, i32) {
    %c0_i32 = arith.constant 0 : i32
    %c0_i32_0 = arith.constant 0 : i32
    %c0_i32_1 = arith.constant 0 : i32
    return %c0_i32, %c0_i32_0 : i32, i32
  }
  func.func @transform_3(%arg0: i32) -> (i32, i32) {
    %c0_i32 = arith.constant 0 : i32
    %c0_i32_0 = arith.constant 0 : i32
    %c0_i32_1 = arith.constant 0 : i32
    return %c0_i32, %c0_i32_0 : i32, i32
  }
  func.func @transform_4(%arg0: i32) -> (i32, i32) {
    %c0_i32 = arith.constant 0 : i32
    %c0_i32_0 = arith.constant 0 : i32
    %c0_i32_1 = arith.constant 0 : i32
    return %c0_i32, %c0_i32_0 : i32, i32
  }
  func.func @transform_5(%arg0: i32) -> (i32, i32) {
    %c0_i32 = arith.constant 0 : i32
    %c0_i32_0 = arith.constant 0 : i32
    %c0_i32_1 = arith.constant 0 : i32
    return %c0_i32, %c0_i32_0 : i32, i32
  }
  func.func @transform_6(%arg0: i32) -> (i32, i32) {
    %c0_i32 = arith.constant 0 : i32
    %c0_i32_0 = arith.constant 0 : i32
    %c0_i32_1 = arith.constant 0 : i32
    return %c0_i32, %c0_i32_0 : i32, i32
  }
  func.func @transform_7(%arg0: i32) -> (i32, i32) {
    %c0_i32 = arith.constant 0 : i32
    %c0_i32_0 = arith.constant 0 : i32
    %c0_i32_1 = arith.constant 0 : i32
    return %c0_i32, %c0_i32_0 : i32, i32
  }
  func.func @transform_8(%arg0: i32) -> (i32, i32) {
    %c0_i32 = arith.constant 0 : i32
    %c0_i32_0 = arith.constant 0 : i32
    %c0_i32_1 = arith.constant 0 : i32
    return %c0_i32, %c0_i32_0 : i32, i32
  }
  func.func @transform_9(%arg0: i32) -> (i32, i32) {
    %c0_i32 = arith.constant 0 : i32
    %c0_i32_0 = arith.constant 0 : i32
    %c0_i32_1 = arith.constant 0 : i32
    return %c0_i32, %c0_i32_0 : i32, i32
  }
  func.func @transform_10(%arg0: i32) -> (i32, i32, i32) {
    %c0_i32 = arith.constant 0 : i32
    %c0_i32_0 = arith.constant 0 : i32
    %c0_i32_1 = arith.constant 0 : i32
    return %arg0, %c0_i32, %c0_i32_0 : i32, i32, i32
  }
}

</mosaic_0001>

<bundles_post_ra>
// kernel: unet_upblock_forward.1
= control target key start
LH: loop header
LB: loop body
LE: loop exit
PB: predicated region body
PF: predicated region fallthrough
CT: control target
= control target key end

     0   :  { %s1298_s13 = smov 0   ;;  %s1745_s0 = inlined_call_operand.vmem [shape: f32[2,8,64], index: 0, kind: input, shape index: {}]   ;;  %s1746_s1 = inlined_call_operand.vmem [shape: f32[2,4,256], index: 1, kind: input, shape index: {}]   ;;  %s1747_s2 = inlined_call_operand.vmem [shape: f32[64,256], index: 2, kind: input, shape index: {}]   ;;  %s1748_s3 = inlined_call_operand.vmem [shape: f32[4,32], index: 3, kind: input, shape index: {}]   ;;  %s1749_s4 = inlined_call_operand.vmem [shape: f32[4,1], index: 4, kind: input, shape index: {}]   ;;  %s1750_s5 = inlined_call_operand.vmem [shape: f32[256,256], index: 5, kind: input, shape index: {}]   ;;  %s1751_s6 = inlined_call_operand.vmem [shape: f32[4,72], index: 6, kind: input, shape index: {}]   ;;  %s1752_s7 = inlined_call_operand.vmem [shape: f32[4,1], index: 7, kind: input, shape index: {}]   ;;  %s1753_s8 = inlined_call_operand.vmem [shape: f32[4,36], index: 8, kind: input, shape index: {}]   ;;  %s1754_s9 = inlined_call_operand.vmem [shape: f32[4,1], index: 9, kind: input, shape index: {}]   ;;  %s1755_s10 = inlined_call_operand.vmem [shape: f32[2,4,256], index: 10, kind: output, shape index: {}]  }
   0x1 LB: > { %s1181_s14 = sadd.s32 4294967295, %s1231_s13   ;;  %p1185_p0 = scmp.ge.s32.totalorder %s1231_s13, 1  ;;  %s1231_s13 = sphi %s1298_s13, %s20_s13  }
   0x2   : > { %p321_p1 = scmp.lt.s32.totalorder %s1231_s13, 3 }
   0x4   : > { %p322_p2 = pnand %p1185_p0, %p321_p1 }
   0x5   : > { %p363_p3 = scmp.lt.s32.totalorder (!%p322_p2), %s1181_s14, 1  ;;  %s1235_s19 = smov (!%p322_p2), 112  }
   0x6   : > { %325 = sbr.rel (%p322_p2) target bundleno = 1463 (0x5b7), region = 60  ;;  %s1237_s27 = smov (!%p322_p2), 127  }
   0x7   : > { %s1238_s15 = smov (!%p322_p2), 94   ;;  %s1239_s16 = smov (!%p322_p2), 95  }
   0x8   : > { %s1240_s17 = smov (!%p322_p2), 96   ;;  %s1241_s20 = smov (!%p322_p2), 110  }
   0xb   : > { %v393_v0 = vld [vmem:[%s1747_s2 + $0x78] sm:$0xff]  ;;  %v392_v1 = vld [vmem:[%s1747_s2 + $0x70] sm:$0xff]  ;;  %v391_v2 = vld [vmem:[%s1747_s2 + $0x68] sm:$0xff]  ;;  %vm471_vm0 = vcmask 277504   ;;  %vm924_vm1 = vcmask 273408   ;;  %v1233_v4 = vmov 0.0  }
   0xc   : > { %414 = vmatprep.subr.mxu0 %v393_v0  ;;  %v390_v3 = vld [vmem:[%s1747_s2 + $0x60] sm:$0xff]  ;;  %462 = vmatprep.mubr.f32.mxu0 %v1233_v4  ;;  %472 = vst.msk [vmem:[#allocation2 + $0x10] sm:$0xff] %vm471_vm0, %v1233_v4  ;;  %743 = vst.msk [vmem:[#allocation3 + $0x10] sm:$0xff] %vm471_vm0, %v1233_v4  ;;  %v389_v5 = vld [vmem:[%s1747_s2 + $0x58] sm:$0xff]  ;;  %s1757_s14 = smov (!%p363_p3, %s1181_s14), 1  ;;  %vm394_vm2 = vcmask 523264  }
   0xd   : > { %925 = vst.msk [vmem:[#allocation4 + $0x8] sm:$0xf] %vm924_vm1, %v1233_v4  ;;  %415 = vmatpush1.msra.mxu0 %v392_v1  ;;  %v388_v6 = vld [vmem:[%s1747_s2 + $0x50] sm:$0xff]  ;;  %v387_v7 = vld [vmem:[%s1747_s2 + $0x48] sm:$0xff]  ;;  %v386_v8 = vld [vmem:[%s1747_s2 + $0x40] sm:$0xff]  ;;  %s1334_s11 = sshll.u32 %s1757_s14, 3 }
   0xe   : > { %416 = vmatprep.subr.mxu0 %v391_v2  ;;  %v385_v9 = vld [vmem:[%s1747_s2 + $0x38] sm:$0xff]  ;;  %s371_s18 = scalar_lea.vmem %s1746_s1, %s1334_s11  ;;  %v384_v10 = vld [vmem:[%s1747_s2 + $0x30] sm:$0xff]  ;;  %v383_v12 = vld [vmem:[%s1747_s2 + $0x28] sm:$0xff]  ;;  %s366_s30 = scalar_lea.vmem %s1745_s0, %s1334_s11  ;;  %v1236_v25 = vmov 0   ;;  %vm507_vm3 = vcmask 908288   ;;  %vm496_vm4 = vcmask 916480  }
   0xf   : > { %417 = vmatpush1.msra.mxu0 %v390_v3  ;;  %v729_v11 = vld [vmem:[%s371_s18] sm:$0xff]  ;;  %v381_v15 = vld [vmem:[%s1747_s2 + $0x18] sm:$0xff]  ;;  %v380_v16 = vld [vmem:[%s1747_s2 + $0x10] sm:$0xff]  ;;  %s1234_s18 = smov 111   ;;  %1219 = vset.pattern.permute.xlu1 %v1236_v25  ;;  %vm485_vm5 = vcmask 1039360   ;;  %vm519_vm6 = vcmask 261120   ;;  %s376_s29 = scalar_lea.vmem %s1755_s10, %s1334_s11 }
  0x10   : > { %418 = vmatprep.subr.mxu0 %v389_v5  ;;  %v731_v13 = vcombine.high %v729_v11, %v729_v11  ;;  %733 = vst [vmem:[#allocation3] sm:$0xf] %v729_v11  ;;  %v382_v14 = vld [vmem:[%s1747_s2 + $0x20] sm:$0xff]  ;;  %v379_v17 = vld [vmem:[%s1747_s2 + $0x8] sm:$0xff]  ;;  %v625_v23 = vld [vmem:[%s1750_s5 + $0xf8] sm:$0xff]  ;;  %1220 = vset.pattern.permute.xlu0 %v1236_v25  ;;  %s1242_s14 = smov 126  }
  0x11   : > { %419 = vmatpush1.msra.mxu0 %v388_v6  ;;  %v378_v18 = vld [vmem:[%s1747_s2] sm:$0xff]  ;;  %v624_v24 = vld [vmem:[%s1750_s5 + $0xf0] sm:$0xff]  ;;  %658 = vmatprep.subr.mxu1 %v625_v23  ;;  %v623_v26 = vld [vmem:[%s1750_s5 + $0xe8] sm:$0xff]  ;;  %vm831_vm7 = vcmask 769024   ;;  %vm820_vm8 = vcmask 777216   ;;  %vm809_vm9 = vcmask 785408  }
  0x12   : > { %420 = vmatprep.subr.mxu0 %v387_v7  ;;  %734 = vst [vmem:[#allocation3 + $0x8] sm:$0xf] %v731_v13  ;;  %v377_v19 = vld [vmem:[%s366_s30] sm:$0xff]  ;;  %659 = vmatpush1.msra.mxu1 %v624_v24  ;;  %v621_v28 = vld [vmem:[%s1750_s5 + $0xd8] sm:$0xff]  ;;  %v620_v29 = vld [vmem:[%s1750_s5 + $0xd0] sm:$0xff]  ;;  %vm798_vm10 = vcmask 900096  }
  0x13   : > { %421 = vmatpush1.msra.mxu0 %v386_v8  ;;  %v475_v20 = vld [vmem:[#allocation2 + $0x10] sm:$0xff]  ;;  %v622_v27 = vld [vmem:[%s1750_s5 + $0xe0] sm:$0xff]  ;;  %660 = vmatprep.subr.mxu1 %v623_v26  ;;  %v619_v30 = vld [vmem:[%s1750_s5 + $0xc8] sm:$0xff]  ;;  %vm767_vm11 = vcmask 1031168   ;;  %vm842_vm12 = vcmask 588800   ;;  %vm1013_vm13 = vcmask 1043456  }
  0x14   : > { %422 = vmatprep.subr.mxu0 %v385_v9  ;;  %505 = vrot.lane.b32.xlu0 %v475_v20, %s1234_s18  ;;  %v618_v31 = vld [vmem:[%s1750_s5 + $0xc0] sm:$0xff]  ;;  %v617_v32 = vld [vmem:[%s1750_s5 + $0xb8] sm:$0xff]  ;;  %v616_v33 = vld [vmem:[%s1750_s5 + $0xb0] sm:$0xff]  ;;  %vm1028_vm14 = vcmask 293888  }
  0x15   : > { %423 = vmatpush1.msra.mxu0 %v384_v10  ;;  %661 = vmatpush1.msra.mxu1 %v622_v27  ;;  %v615_v34 = vld [vmem:[%s1750_s5 + $0xa8] sm:$0xff]  ;;  %v513_v35 = vld [vmem:[%s1749_s4] sm:$0xf]  ;;  %v613_v37 = vld [vmem:[%s1750_s5 + $0x98] sm:$0xff] }
  0x16   : > { %424 = vmatprep.subr.mxu0 %v383_v12  ;;  %662 = vmatprep.subr.mxu1 %v621_v28  ;;  %v614_v36 = vld [vmem:[%s1750_s5 + $0xa0] sm:$0xff]  ;;  %v612_v38 = vld [vmem:[%s1750_s5 + $0x90] sm:$0xff]  ;;  %v611_v39 = vld [vmem:[%s1750_s5 + $0x88] sm:$0xff] }
  0x17   : > { %425 = vmatpush1.msra.mxu0 %v382_v14  ;;  %663 = vmatpush1.msra.mxu1 %v620_v29  ;;  %v610_v40 = vld [vmem:[%s1750_s5 + $0x80] sm:$0xff]  ;;  %v609_v41 = vld [vmem:[%s1750_s5 + $0x78] sm:$0xff]  ;;  %v608_v42 = vld [vmem:[%s1750_s5 + $0x70] sm:$0xff] }
  0x18   : > { %426 = vmatprep.subr.mxu0 %v381_v15  ;;  %494 = vrot.lane.b32.xlu0 %v475_v20, %s1235_s19  ;;  %v607_v43 = vld [vmem:[%s1750_s5 + $0x68] sm:$0xff]  ;;  %v606_v44 = vld [vmem:[%s1750_s5 + $0x60] sm:$0xff]  ;;  %v605_v45 = vld [vmem:[%s1750_s5 + $0x58] sm:$0xff] }
  0x19   : > { %427 = vmatpush1.msra.mxu0 %v380_v16  ;;  %664 = vmatprep.subr.mxu1 %v619_v30  ;;  %v604_v46 = vld [vmem:[%s1750_s5 + $0x50] sm:$0xff]  ;;  %v603_v47 = vld [vmem:[%s1750_s5 + $0x48] sm:$0xff]  ;;  %v602_v48 = vld [vmem:[%s1750_s5 + $0x40] sm:$0xff] }
  0x1a   : > { %428 = vmatprep.subr.mxu0 %v379_v17  ;;  %665 = vmatpush1.msra.mxu1 %v618_v31  ;;  %v601_v49 = vld [vmem:[%s1750_s5 + $0x38] sm:$0xff]  ;;  %v600_v50 = vld [vmem:[%s1750_s5 + $0x30] sm:$0xff]  ;;  %v599_v51 = vld [vmem:[%s1750_s5 + $0x28] sm:$0xff] }
  0x1b   : > { %429 = vmatpush1.msra.mxu0 %v378_v18  ;;  %666 = vmatprep.subr.mxu1 %v617_v32  ;;  %v598_v52 = vld [vmem:[%s1750_s5 + $0x20] sm:$0xff]  ;;  %v597_v53 = vld [vmem:[%s1750_s5 + $0x18] sm:$0xff]  ;;  %v596_v54 = vld [vmem:[%s1750_s5 + $0x10] sm:$0xff] }
  0x1c   : > { %1191 = vmatmul.mubr.msk.f32.vlgmr.msra.gmra.mxu0 %vm394_vm2, %v377_v19  ;;  %667 = vmatpush1.msra.mxu1 %v616_v33  ;;  %v595_v55 = vld [vmem:[%s1750_s5 + $0x8] sm:$0xff]  ;;  %v594_v56 = vld [vmem:[%s1750_s5] sm:$0xff]  ;;  %v657_v57 = vld [vmem:[%s1750_s5 + $0x1f8] sm:$0xff] }
  0x1d   : > { %587 = vmatprep.mubr.f32.mxu0 %v1233_v4  ;;  %668 = vmatprep.subr.mxu1 %v615_v34  ;;  %v656_v58 = vld [vmem:[%s1750_s5 + $0x1f0] sm:$0xff]  ;;  %v655_v59 = vld [vmem:[%s1750_s5 + $0x1e8] sm:$0xff]  ;;  %v654_v60 = vld [vmem:[%s1750_s5 + $0x1e0] sm:$0xff] }
  0x1e   : > { %669 = vmatpush1.msra.mxu1 %v614_v36  ;;  %v653_v61 = vld [vmem:[%s1750_s5 + $0x1d8] sm:$0xff]  ;;  %v652_v62 = vld [vmem:[%s1750_s5 + $0x1d0] sm:$0xff]  ;;  %v651_v63 = vld [vmem:[%s1750_s5 + $0x1c8] sm:$0xff] }
  0x1f   : > { %670 = vmatprep.subr.mxu1 %v613_v37  ;;  %v650_v0 = vld [vmem:[%s1750_s5 + $0x1c0] sm:$0xff]  ;;  %v649_v1 = vld [vmem:[%s1750_s5 + $0x1b8] sm:$0xff]  ;;  %v648_v2 = vld [vmem:[%s1750_s5 + $0x1b0] sm:$0xff] }
  0x20   : > { %671 = vmatpush1.msra.mxu1 %v612_v38  ;;  %v647_v3 = vld [vmem:[%s1750_s5 + $0x1a8] sm:$0xff]  ;;  %v646_v5 = vld [vmem:[%s1750_s5 + $0x1a0] sm:$0xff]  ;;  %v645_v6 = vld [vmem:[%s1750_s5 + $0x198] sm:$0xff] }
  0x21   : > { %672 = vmatprep.subr.mxu1 %v611_v39  ;;  %v644_v7 = vld [vmem:[%s1750_s5 + $0x190] sm:$0xff]  ;;  %v643_v8 = vld [vmem:[%s1750_s5 + $0x188] sm:$0xff]  ;;  %v642_v9 = vld [vmem:[%s1750_s5 + $0x180] sm:$0xff] }
  0x22   : > { %673 = vmatpush1.msra.mxu1 %v610_v40  ;;  %v641_v10 = vld [vmem:[%s1750_s5 + $0x178] sm:$0xff]  ;;  %v640_v11 = vld [vmem:[%s1750_s5 + $0x170] sm:$0xff]  ;;  %v639_v12 = vld [vmem:[%s1750_s5 + $0x168] sm:$0xff] }
  0x23   : > { %674 = vmatprep.subr.mxu1 %v609_v41  ;;  %v638_v13 = vld [vmem:[%s1750_s5 + $0x160] sm:$0xff]  ;;  %v637_v14 = vld [vmem:[%s1750_s5 + $0x158] sm:$0xff]  ;;  %v636_v15 = vld [vmem:[%s1750_s5 + $0x150] sm:$0xff] }
  0x24   : > { %675 = vmatpush1.msra.mxu1 %v608_v42  ;;  %v635_v16 = vld [vmem:[%s1750_s5 + $0x148] sm:$0xff]  ;;  %v634_v17 = vld [vmem:[%s1750_s5 + $0x140] sm:$0xff]  ;;  %v633_v18 = vld [vmem:[%s1750_s5 + $0x138] sm:$0xff] }
  0x25   : > { %676 = vmatprep.subr.mxu1 %v607_v43  ;;  %v632_v19 = vld [vmem:[%s1750_s5 + $0x130] sm:$0xff]  ;;  %v512_v38 = vld [vmem:[%s1748_s3] sm:$0xf]  ;;  %v629_v40 = vld [vmem:[%s1750_s5 + $0x118] sm:$0xff] }
  0x26   : > { %677 = vmatpush1.msra.mxu1 %v606_v44  ;;  %v630_v39 = vld [vmem:[%s1750_s5 + $0x120] sm:$0xff]  ;;  %v628_v41 = vld [vmem:[%s1750_s5 + $0x110] sm:$0xff]  ;;  %v747_v42 = vld [vmem:[#allocation3 + $0x10] sm:$0xff] }
  0x27   : > { %678 = vmatprep.subr.mxu1 %v605_v45 }
  0x28   : > { %679 = vmatpush1.msra.mxu1 %v604_v46 }
  0x29   : > { %680 = vmatprep.subr.mxu1 %v603_v47 }
  0x2a   : > { %681 = vmatpush1.msra.mxu1 %v602_v48 }
  0x2b   : > { %682 = vmatprep.subr.mxu1 %v601_v49 }
  0x2c   : > { %683 = vmatpush1.msra.mxu1 %v600_v50 }
  0x2d   : > { %684 = vmatprep.subr.mxu1 %v599_v51 }
  0x2e   : > { %685 = vmatpush1.msra.mxu1 %v598_v52 }
  0x2f   : > { %686 = vmatprep.subr.mxu1 %v597_v53 }
  0x30   : > { %687 = vmatpush1.msra.mxu1 %v596_v54  ;;  %v836_v54 = vld [vmem:[%s1752_s7] sm:$0xf] }
  0x31   : > { %688 = vmatprep.subr.mxu1 %v595_v55 }
  0x32   : > { %689 = vmatpush1.msra.mxu1 %v594_v56 }
  0x33   : > { %690 = vmatprep.subr.mxu1 %v657_v57 }
  0x34   : > { %691 = vmatpush2.msra.mxu1 %v656_v58 }
  0x35   : > { %692 = vmatprep.subr.mxu1 %v655_v59 }
  0x36   : > { %693 = vmatpush2.msra.mxu1 %v654_v60 }
  0x37   : > { %694 = vmatprep.subr.mxu1 %v653_v61 }
  0x38   : > { %695 = vmatpush2.msra.mxu1 %v652_v62 }
  0x39   : > { %696 = vmatprep.subr.mxu1 %v651_v63 }
  0x3a   : > { %697 = vmatpush2.msra.mxu1 %v650_v0 }
  0x3b   : > { %698 = vmatprep.subr.mxu1 %v649_v1 }
  0x3c   : > { %699 = vmatpush2.msra.mxu1 %v648_v2 }
  0x3d   : > { %700 = vmatprep.subr.mxu1 %v647_v3 }
  0x3e   : > { %701 = vmatpush2.msra.mxu1 %v646_v5 }
  0x3f   : > { %702 = vmatprep.subr.mxu1 %v645_v6 }
  0x40   : > { %703 = vmatpush2.msra.mxu1 %v644_v7 }
  0x41   : > { %704 = vmatprep.subr.mxu1 %v643_v8 }
  0x42   : > { %705 = vmatpush2.msra.mxu1 %v642_v9 }
  0x43   : > { %706 = vmatprep.subr.mxu1 %v641_v10 }
  0x44   : > { %707 = vmatpush2.msra.mxu1 %v640_v11 }
  0x45   : > { %708 = vmatprep.subr.mxu1 %v639_v12 }
  0x46   : > { %709 = vmatpush2.msra.mxu1 %v638_v13 }
  0x47   : > { %710 = vmatprep.subr.mxu1 %v637_v14 }
  0x48   : > { %711 = vmatpush2.msra.mxu1 %v636_v15 }
  0x49   : > { %712 = vmatprep.subr.mxu1 %v635_v16 }
  0x4a   : > { %713 = vmatpush2.msra.mxu1 %v634_v17 }
  0x4b   : > { %714 = vmatprep.subr.mxu1 %v633_v18 }
  0x4c   : > { %715 = vmatpush2.msra.mxu1 %v632_v19 }
  0x86   : > { %v506_v23 = vpop.permute.xlu0 %505 }
  0x8a   : > { %v495_v24 = vpop.permute.xlu0 %494 }
  0xdc   : > { %v1371_v21 = vpop.f32.mrf.mxu0 }
  0xdd   : > { %501 = vrot.lane.b32.xlu1 %v1371_v21, %s1234_s18 }
  0xde   : > { %v1375_v22 = vpop.f32.mrf.mxu0 }
  0xdf   : > { %503 = vrot.lane.b32.xlu0 %v1375_v22, %s1234_s18 }
  0xe1   : > { %490 = vrot.lane.b32.xlu1 %v1371_v21, %s1235_s19 }
  0xe3   : > { %481 = vrot.lane.b32.xlu0 %v1375_v22, %s1237_s27 }
  0xe5   : > { %492 = vrot.lane.b32.xlu1 %v1375_v22, %s1235_s19 }
  0xe7   : > { %479 = vrot.lane.b32.xlu0 %v1371_v21, %s1237_s27 }
  0xe9   : > { %483 = vrot.lane.b32.xlu1 %v475_v20, %s1237_s27  ;;  %v631_v20 = vld [vmem:[%s1750_s5 + $0x128] sm:$0xff] }
  0xea   : > { %716 = vmatprep.subr.mxu1 %v631_v20 }
  0xeb   : > { %717 = vmatpush2.msra.mxu1 %v630_v39  ;;  %818 = vrot.lane.b32.xlu0 %v747_v42, %s1239_s16 }
  0xec   : > { %718 = vmatprep.subr.mxu1 %v629_v40 }
  0xed   : > { %516 = vperm.xlu1 %1219, %v513_v35   ;;  %719 = vmatpush2.msra.mxu1 %v628_v41 }
  0xef   : > { %796 = vrot.lane.b32.xlu0 %v747_v42, %s1241_s20 }
  0xf1   : > { %829 = vrot.lane.b32.xlu1 %v747_v42, %s1238_s15 }
  0xf3   : > { %776 = vrot.lane.b32.xlu0 %v747_v42, %s1235_s19 }
  0xf5   : > { %807 = vrot.lane.b32.xlu1 %v747_v42, %s1240_s17 }
  0xf9   : > { %786 = vrot.lane.b32.xlu1 %v747_v42, %s1234_s18 }
  0xfd   : > { %765 = vrot.lane.b32.xlu1 %v747_v42, %s1242_s14 }
 0x14f   : > { %v502_v25 = vpop.permute.xlu1 %501 }
 0x151   : > { %v504_v26 = vpop.permute.xlu0 %503 }
 0x152   : > { %v508_v27 = vsel %vm507_vm3, %v502_v25, %v504_v26  ;;  %v509_v28 = vsel %vm507_vm3, %v504_v26, %v506_v23 }
 0x153   : > { %v491_v29 = vpop.permute.xlu1 %490  ;;  %547 = vmatprep.subr.mxu0 %v509_v28 }
 0x154   : > { %548 = vmatpush1.msra.mxu0 %v508_v27 }
 0x155   : > { %v482_v30 = vpop.permute.xlu0 %481 }
 0x157   : > { %v493_v31 = vpop.permute.xlu1 %492 }
 0x158   : > { %v497_v32 = vsel %vm496_vm4, %v491_v29, %v493_v31  ;;  %v498_v33 = vsel %vm496_vm4, %v493_v31, %v495_v24 }
 0x159   : > { %549 = vmatprep.subr.mxu0 %v498_v33  ;;  %v480_v34 = vpop.permute.xlu0 %479 }
 0x15a   : > { %550 = vmatpush1.msra.mxu0 %v497_v32  ;;  %v486_v37 = vsel %vm485_vm5, %v480_v34, %v482_v30  ;;  %v744_v34 = vld [vmem:[%s1751_s6] sm:$0xf] }
 0x15b   : > { %v484_v35 = vpop.permute.xlu1 %483 }
 0x15c   : > { %v487_v36 = vsel %vm485_vm5, %v482_v30, %v484_v35  ;;  %v928_v35 = vld [vmem:[#allocation4 + $0x8] sm:$0xf] }
 0x15d   : > { %551 = vmatprep.subr.mxu0 %v487_v36  ;;  %v819_v57 = vpop.permute.xlu0 %818  ;;  %v934_v36 = vcombine.low %v928_v35, %v928_v35 }
 0x15e   : > { %552 = vmatpush1.msra.mxu0 %v486_v37 }
 0x15f   : > { %553 = vmatprep.subr.mxu0 %v1375_v22  ;;  %v626_v22 = vld [vmem:[%s1750_s5 + $0x100] sm:$0xff] }
 0x160   : > { %554 = vmatpush1.msra.mxu0 %v1371_v21  ;;  %v627_v21 = vld [vmem:[%s1750_s5 + $0x108] sm:$0xff] }
 0x161   : > { %1192 = vmatmul.mubr.msk.f32.vlgmr.msra.gmra.mxu0 %vm519_vm6, %v512_v38  ;;  %720 = vmatprep.subr.mxu1 %v627_v21  ;;  %v797_v59 = vpop.permute.xlu0 %796 }
 0x162   : > { %910 = vmatprep.mubr.f32.mxu0 %v1233_v4  ;;  %721 = vmatpush2.msra.mxu1 %v626_v22 }
 0x165   : > { %v777_v61 = vpop.permute.xlu0 %776 }
 0x168   : > { %v517_v44 = vpop.permute.xlu1 %516 }
 0x16c   : > { %v830_v55 = vpop.permute.xlu1 %829 }
 0x170   : > { %v808_v56 = vpop.permute.xlu1 %807 }
 0x174   : > { %v787_v58 = vpop.permute.xlu1 %786 }
 0x178   : > { %v766_v60 = vpop.permute.xlu1 %765 }
 0x221   : > { %v589_v43 = vpop.f32.mrf.mxu0 }
 0x222   : > { %v590_v47 = vadd.f32 %v589_v43, %v517_v44 }
 0x223   : > { %v591_v45 = vpop.f32.mrf.mxu0 }
 0x224   : > { %v592_v46 = vadd.f32 %v591_v45, %v517_v44  ;;  %v1022_v44 = vld [vmem:[%s1754_s9] sm:$0xf] }
 0x226   : > { %722 = vmatprep.mubr.f32.mxu1 %v592_v46 }
 0x227   : > { %723 = vmatmul.mubr.f32.vlgmr.msra.gmra.mxu1 %v590_v47 }
 0x2e7   : > { %v724_v48 = vpop.f32.mrf.mxu1 }
 0x2e8   : > { %v737_v49 = vrot.slane %v724_v48, 4 }
 0x2e9   : > { %v726_v50 = vpop.f32.mrf.mxu1 }
 0x2ea   : > { %741 = vst [vmem:[#allocation3] sm:$0xf0] %v737_v49  ;;  %v738_v51 = vrot.slane %v726_v50, 4 }
 0x2ec   : > { %742 = vst [vmem:[#allocation3 + $0x8] sm:$0xf0] %v738_v51 }
 0x2f1   : > { %v1602_v52 = vld [vmem:[#allocation3] sm:$0xff] }
 0x2f2   : > { %814 = vrot.lane.b32.xlu1 %v1602_v52, %s1239_s16  ;;  %825 = vrot.lane.b32.xlu0 %v1602_v52, %s1238_s15 }
 0x2f3   : > { %v1616_v53 = vld [vmem:[#allocation3 + $0x8] sm:$0xff] }
 0x2f6   : > { %792 = vrot.lane.b32.xlu1 %v1602_v52, %s1241_s20  ;;  %803 = vrot.lane.b32.xlu0 %v1602_v52, %s1240_s17 }
 0x2fa   : > { %772 = vrot.lane.b32.xlu1 %v1602_v52, %s1235_s19  ;;  %782 = vrot.lane.b32.xlu0 %v1602_v52, %s1234_s18 }
 0x2fe   : > { %761 = vrot.lane.b32.xlu0 %v1602_v52, %s1242_s14  ;;  %816 = vrot.lane.b32.xlu1 %v1616_v53, %s1239_s16 }
 0x302   : > { %794 = vrot.lane.b32.xlu1 %v1616_v53, %s1241_s20  ;;  %827 = vrot.lane.b32.xlu0 %v1616_v53, %s1238_s15 }
 0x306   : > { %774 = vrot.lane.b32.xlu1 %v1616_v53, %s1235_s19  ;;  %805 = vrot.lane.b32.xlu0 %v1616_v53, %s1240_s17 }
 0x30a   : > { %753 = vrot.lane.b32.xlu1 %v1616_v53, %s1237_s27  ;;  %784 = vrot.lane.b32.xlu0 %v1616_v53, %s1234_s18 }
 0x30e   : > { %751 = vrot.lane.b32.xlu1 %v1602_v52, %s1237_s27  ;;  %763 = vrot.lane.b32.xlu0 %v1616_v53, %s1242_s14 }
 0x312   : > { %755 = vrot.lane.b32.xlu0 %v747_v42, %s1237_s27  ;;  %1009 = vrot.lane.b32.xlu1 %v928_v35, %s1238_s15 }
 0x316   : > { %839 = vperm.xlu0 %1220, %v836_v54   ;;  %989 = vrot.lane.b32.xlu1 %v928_v35, %s1240_s17 }
 0x31a   : > { %969 = vrot.lane.b32.xlu0 %v928_v35, %s1234_s18  ;;  %999 = vrot.lane.b32.xlu1 %v934_v36, %s1239_s16 }
 0x31e   : > { %979 = vrot.lane.b32.xlu0 %v934_v36, %s1241_s20 }
 0x322   : > { %949 = vrot.lane.b32.xlu0 %v928_v35, %s1242_s14 }
 0x326   : > { %959 = vrot.lane.b32.xlu0 %v934_v36, %s1235_s19 }
 0x364   : > { %v815_v62 = vpop.permute.xlu1 %814  ;;  %v826_v63 = vpop.permute.xlu0 %825 }
 0x368   : > { %v793_v0 = vpop.permute.xlu1 %792  ;;  %v804_v1 = vpop.permute.xlu0 %803 }
 0x36c   : > { %v773_v2 = vpop.permute.xlu1 %772  ;;  %v783_v3 = vpop.permute.xlu0 %782 }
 0x370   : > { %v817_v5 = vpop.permute.xlu1 %816  ;;  %v762_v6 = vpop.permute.xlu0 %761 }
 0x371   : > { %v822_v11 = vsel %vm820_vm8, %v817_v5, %v819_v57  ;;  %v821_v12 = vsel %vm820_vm8, %v815_v62, %v817_v5 }
 0x374   : > { %v795_v7 = vpop.permute.xlu1 %794  ;;  %v828_v8 = vpop.permute.xlu0 %827 }
 0x375   : > { %v832_v9 = vsel %vm831_vm7, %v826_v63, %v828_v8  ;;  %v833_v10 = vsel %vm831_vm7, %v828_v8, %v830_v55  ;;  %v800_v17 = vsel %vm798_vm10, %v795_v7, %v797_v59  ;;  %v799_v18 = vsel %vm798_vm10, %v793_v0, %v795_v7 }
 0x376   : > { %860 = vmatprep.subr.mxu0 %v833_v10 }
 0x377   : > { %861 = vmatpush1.msra.mxu0 %v832_v9 }
 0x378   : > { %v775_v13 = vpop.permute.xlu1 %774  ;;  %862 = vmatprep.subr.mxu0 %v822_v11  ;;  %v806_v14 = vpop.permute.xlu0 %805 }
 0x379   : > { %v810_v15 = vsel %vm809_vm9, %v804_v1, %v806_v14  ;;  %863 = vmatpush1.msra.mxu0 %v821_v12  ;;  %v811_v16 = vsel %vm809_vm9, %v806_v14, %v808_v56  ;;  %v779_v25 = vsel %vm496_vm4, %v775_v13, %v777_v61  ;;  %v778_v26 = vsel %vm496_vm4, %v773_v2, %v775_v13 }
 0x37a   : > { %864 = vmatprep.subr.mxu0 %v811_v16 }
 0x37b   : > { %865 = vmatpush1.msra.mxu0 %v810_v15 }
 0x37c   : > { %866 = vmatprep.subr.mxu0 %v800_v17  ;;  %v785_v19 = vpop.permute.xlu0 %784  ;;  %v754_v20 = vpop.permute.xlu1 %753 }
 0x37d   : > { %v788_v23 = vsel %vm507_vm3, %v783_v3, %v785_v19  ;;  %867 = vmatpush1.msra.mxu0 %v799_v18  ;;  %v789_v24 = vsel %vm507_vm3, %v785_v19, %v787_v58 }
 0x37e   : > { %868 = vmatprep.subr.mxu0 %v789_v24 }
 0x37f   : > { %869 = vmatpush1.msra.mxu0 %v788_v23 }
 0x380   : > { %870 = vmatprep.subr.mxu0 %v779_v25  ;;  %v764_v27 = vpop.permute.xlu0 %763  ;;  %v752_v30 = vpop.permute.xlu1 %751 }
 0x381   : > { %v768_v28 = vsel %vm767_vm11, %v762_v6, %v764_v27  ;;  %871 = vmatpush1.msra.mxu0 %v778_v26  ;;  %v769_v29 = vsel %vm767_vm11, %v764_v27, %v766_v60  ;;  %v757_v33 = vsel %vm485_vm5, %v752_v30, %v754_v20 }
 0x382   : > { %872 = vmatprep.subr.mxu0 %v769_v29 }
 0x383   : > { %873 = vmatpush1.msra.mxu0 %v768_v28 }
 0x384   : > { %v756_v31 = vpop.permute.xlu0 %755  ;;  %v1010_v46 = vpop.permute.xlu1 %1009 }
 0x385   : > { %v758_v32 = vsel %vm485_vm5, %v754_v20, %v756_v31  ;;  %v926_v31 = vld [vmem:[%s1753_s8] sm:$0xf] }
 0x386   : > { %874 = vmatprep.subr.mxu0 %v758_v32 }
 0x387   : > { %875 = vmatpush1.msra.mxu0 %v757_v33 }
 0x388   : > { %876 = vmatprep.subr.mxu0 %v1616_v53  ;;  %v990_v48 = vpop.permute.xlu1 %989 }
 0x389   : > { %877 = vmatpush1.msra.mxu0 %v1602_v52 }
 0x38a   : > { %1193 = vmatmul.mubr.msk.f32.vlgmr.msra.gmra.mxu0 %vm842_vm12, %v744_v34 }
 0x38b   : > { %1100 = vmatprep.mubr.f32.mxu0 %v1233_v4 }
 0x38c   : > { %v1000_v50 = vpop.permute.xlu1 %999 }
 0x391   : > { %v840_v37 = vpop.permute.xlu0 %839 }
 0x395   : > { %v970_v45 = vpop.permute.xlu0 %969 }
 0x399   : > { %v980_v47 = vpop.permute.xlu0 %979 }
 0x39d   : > { %v950_v49 = vpop.permute.xlu0 %949 }
 0x3a1   : > { %v960_v51 = vpop.permute.xlu0 %959 }
 0x44a   : > { %v912_v38 = vpop.f32.mrf.mxu0 }
 0x44b   : > { %v913_v39 = vadd.f32 %v912_v38, %v840_v37 }
 0x44c   : > { %v914_v4 = vpop.f32.mrf.mxu0 }
 0x44d   : > { %v915_v40 = vadd.f32 %v914_v4, %v840_v37  ;;  %v917_v41 = vmax.f32 %v913_v39, 0.0 }
 0x44f   : > { %v918_v21 = vmax.f32 %v915_v40, 0.0  ;;  %v1224_v43 = vcombine.low %v917_v41, %v917_v41 }
 0x451   : > { %v1671_v22 = vcombine.low %v917_v41, %v918_v21  ;;  %v1681_v42 = vcombine.low %v918_v21, %v918_v21 }
 0x453   : > { %985 = vrot.lane.b32.xlu1 %v1671_v22, %s1240_s17  ;;  %997 = vrot.lane.b32.xlu0 %v1671_v22, %s1239_s16 }
 0x457   : > { %977 = vrot.lane.b32.xlu1 %v1671_v22, %s1241_s20  ;;  %1005 = vrot.lane.b32.xlu0 %v1671_v22, %s1238_s15 }
 0x45b   : > { %965 = vrot.lane.b32.xlu1 %v1671_v22, %s1234_s18  ;;  %987 = vrot.lane.b32.xlu0 %v1681_v42, %s1240_s17 }
 0x45f   : > { %957 = vrot.lane.b32.xlu1 %v1671_v22, %s1235_s19  ;;  %995 = vrot.lane.b32.xlu0 %v1224_v43, %s1239_s16 }
 0x463   : > { %945 = vrot.lane.b32.xlu1 %v1671_v22, %s1242_s14  ;;  %975 = vrot.lane.b32.xlu0 %v1224_v43, %s1241_s20 }
 0x467   : > { %937 = vrot.lane.b32.xlu1 %v1671_v22, %s1237_s27  ;;  %955 = vrot.lane.b32.xlu0 %v1224_v43, %s1235_s19 }
 0x46b   : > { %939 = vrot.lane.b32.xlu0 %v934_v36, %s1237_s27  ;;  %1007 = vrot.lane.b32.xlu1 %v1681_v42, %s1238_s15 }
 0x46f   : > { %1025 = vperm.xlu0 %1220, %v1022_v44   ;;  %967 = vrot.lane.b32.xlu1 %v1681_v42, %s1234_s18 }
 0x473   : > { %947 = vrot.lane.b32.xlu1 %v1681_v42, %s1242_s14 }
 0x477   : > { %935 = vrot.lane.b32.xlu1 %v1224_v43, %s1237_s27 }
 0x4c5   : > { %v986_v52 = vpop.permute.xlu1 %985  ;;  %v998_v53 = vpop.permute.xlu0 %997 }
 0x4c6   : > { %v1002_v6 = vsel %vm820_vm8, %v998_v53, %v1000_v50 }
 0x4c9   : > { %v978_v54 = vpop.permute.xlu1 %977  ;;  %v1006_v55 = vpop.permute.xlu0 %1005 }
 0x4ca   : > { %v982_v11 = vsel %vm798_vm10, %v978_v54, %v980_v47 }
 0x4cd   : > { %v966_v56 = vpop.permute.xlu1 %965  ;;  %v988_v57 = vpop.permute.xlu0 %987 }
 0x4ce   : > { %v992_v63 = vsel %vm809_vm9, %v988_v57, %v990_v48  ;;  %v991_v7 = vsel %vm809_vm9, %v986_v52, %v988_v57 }
 0x4cf   : > { %v1021_v8 = vsel %vm1013_vm13, %v992_v63, %v1002_v6 }
 0x4d1   : > { %v958_v58 = vpop.permute.xlu1 %957  ;;  %v996_v59 = vpop.permute.xlu0 %995 }
 0x4d2   : > { %v1001_v2 = vsel %vm820_vm8, %v996_v59, %v998_v53  ;;  %v962_v18 = vsel %vm496_vm4, %v958_v58, %v960_v51 }
 0x4d3   : > { %v1020_v10 = vsel %vm1013_vm13, %v991_v7, %v1001_v2 }
 0x4d5   : > { %v946_v60 = vpop.permute.xlu1 %945  ;;  %v976_v61 = vpop.permute.xlu0 %975 }
 0x4d6   : > { %v981_v12 = vsel %vm798_vm10, %v976_v61, %v978_v54 }
 0x4d9   : > { %v938_v62 = vpop.permute.xlu1 %937  ;;  %v956_v0 = vpop.permute.xlu0 %955 }
 0x4da   : > { %v961_v20 = vsel %vm496_vm4, %v956_v0, %v958_v58 }
 0x4dd   : > { %v1008_v1 = vpop.permute.xlu1 %1007  ;;  %v940_v15 = vpop.permute.xlu0 %939 }
 0x4de   : > { %v1011_v3 = vsel %vm831_vm7, %v1006_v55, %v1008_v1  ;;  %v1012_v5 = vsel %vm831_vm7, %v1008_v1, %v1010_v46  ;;  %v942_v23 = vsel %vm485_vm5, %v938_v62, %v940_v15 }
 0x4df   : > { %1194 = vmatprep.subr.msk.mxu0 %vm1013_vm13, %v1012_v5  ;;  %v1015_v29 = vsel %vm1013_vm13, %v1681_v42, %v942_v23 }
 0x4e0   : > { %1195 = vmatpush1.msk.msra.mxu0 %vm1013_vm13, %v1011_v3 }
 0x4e1   : > { %v968_v9 = vpop.permute.xlu1 %967  ;;  %1060 = vmatprep.subr.mxu0 %v1021_v8 }
 0x4e2   : > { %v971_v13 = vsel %vm507_vm3, %v966_v56, %v968_v9  ;;  %v972_v14 = vsel %vm507_vm3, %v968_v9, %v970_v45  ;;  %1061 = vmatpush1.msra.mxu0 %v1020_v10 }
 0x4e3   : > { %v1019_v16 = vsel %vm1013_vm13, %v972_v14, %v982_v11  ;;  %v1018_v17 = vsel %vm1013_vm13, %v971_v13, %v981_v12 }
 0x4e4   : > { %1062 = vmatprep.subr.mxu0 %v1019_v16 }
 0x4e5   : > { %v948_v19 = vpop.permute.xlu1 %947  ;;  %1063 = vmatpush1.msra.mxu0 %v1018_v17 }
 0x4e6   : > { %v951_v24 = vsel %vm767_vm11, %v946_v60, %v948_v19  ;;  %v952_v25 = vsel %vm767_vm11, %v948_v19, %v950_v49 }
 0x4e7   : > { %v1017_v26 = vsel %vm1013_vm13, %v952_v25, %v962_v18  ;;  %v1016_v27 = vsel %vm1013_vm13, %v951_v24, %v961_v20 }
 0x4e8   : > { %1064 = vmatprep.subr.mxu0 %v1017_v26 }
 0x4e9   : > { %v936_v28 = vpop.permute.xlu1 %935  ;;  %1065 = vmatpush1.msra.mxu0 %v1016_v27 }
 0x4ea   : > { %v941_v30 = vsel %vm485_vm5, %v936_v28, %v938_v62  ;;  %1066 = vmatprep.subr.mxu0 %v1015_v29  ;;  %v1026_v33 = vpop.permute.xlu0 %1025 }
 0x4eb   : > { %v1014_v32 = vsel %vm1013_vm13, %v1671_v22, %v941_v30 }
 0x4ec   : > { %1067 = vmatpush1.msra.mxu0 %v1014_v32 }
 0x4ed   : > { %1196 = vmatmul.mubr.msk.f32.vlgmr.msra.gmra.mxu0 %vm1028_vm14, %v926_v31 }
 0x5ad   : > { %v1102_v34 = vpop.f32.mrf.mxu0 }
 0x5ae   : > { %v1103_v35 = vadd.f32 %v1102_v34, %v1026_v33 }
 0x5af   : > { %v1104_v36 = vpop.f32.mrf.mxu0 }
 0x5b0   : > { %v1105_v37 = vadd.f32 %v1104_v36, %v1026_v33  ;;  %v1107_v38 = vmax.f32 %v1103_v35, 0.0 }
 0x5b2   : > { %v1108_v39 = vmax.f32 %v1105_v37, 0.0 }
 0x5b4   : > { %v1111_v4 = vcombine.low %v1107_v38, %v1108_v39 }
 0x5b6   : > { %1113 = vst [vmem:[%s376_s29] sm:$0xff] %v1111_v4 }
 0x5b7 PF: > { %s20_s13 = sadd.s32 1, %s1231_s13  }
 0x5b8   : > { %p17_p4 = scmp.ge.s32.totalorder %s20_s13, 4  }
 0x5ba   :  { %19 = sbr.rel (!%p17_p4) target bundleno = 1 (0x1), region = 93 }

</bundles_post_ra>
